<compile_context>
chip_gen: v5e
topology: v5e:2x2
jax: 0.10.0
libtpu: 0.0.40
codegen_flags: <defaults>
</compile_context>

<pallas_src>
import jax
import jax.numpy as jnp
from jax.experimental import pallas as pl
from jax.experimental.pallas import tpu as pltpu


def _cayley_kernel(w_ref, s_ref, o_ref):
    # w_ref : (C, 1, D)  f32  rows w_c^T, where w_c = inv(I + S_c) @ x_c (from glue solve)
    # s_ref : (C, D, D)  f32  skew-symmetric S_c
    # o_ref : (C, 1, D)  f32  rows y_c^T = w_c^T + w_c^T @ S_c  ( == (R_c @ x_c)^T )
    w = w_ref[...]
    ws = jnp.einsum('cod,cde->coe', w, s_ref[...],
                    preferred_element_type=jnp.float32)   # batched (1,D)x(D,D) on MXU
    o_ref[...] = (w + ws).astype(o_ref.dtype)


def cayley_rot_forward(weights, x, num_dim, num_cls):
    """weights: (num_cls, ngf) float32 — per-class 1x1-conv weights (squeezed).
       x      : (num_dim, num_cls) float32.
       returns: (num_dim, num_cls) float32."""
    D, C = num_dim, num_cls

    # --- glue: build skew-symmetric S_c and pre-solve the (I + S_c) factor ---
    row_ind, col_ind = jnp.triu_indices(D, k=1)
    base = jnp.zeros((C, D, D), jnp.float32).at[:, row_ind, col_ind].set(weights)
    S = 0.5 * (base - jnp.transpose(base, (0, 2, 1)))          # (C, D, D), skew-symmetric
    I = jnp.eye(D, dtype=jnp.float32)

    # w_c = inv(I + S_c) @ x_c via one batched solve (cheaper & better conditioned than inv)
    x_cols = jnp.transpose(x, (1, 0)).astype(jnp.float32)[:, :, None]   # (C, D, 1)
    W = jnp.linalg.solve(I[None] + S, x_cols)                           # (C, D, 1)
    W_rows = jnp.transpose(W, (0, 2, 1))                                # (C, 1, D)

    out_rows = pl.pallas_call(
        _cayley_kernel,
        out_shape=jax.ShapeDtypeStruct((C, 1, D), jnp.float32),
        grid_spec=pltpu.PrefetchScalarGridSpec(
            num_scalar_prefetch=0,
            grid=(1,),                                     # single step: all classes resident
            in_specs=[
                pl.BlockSpec((C, 1, D), lambda i: (0, 0, 0)),
                pl.BlockSpec((C, D, D), lambda i: (0, 0, 0)),
            ],
            out_specs=pl.BlockSpec((C, 1, D), lambda i: (0, 0, 0)),
        ),
    )(W_rows, S)

    # (C, 1, D) -> (D, C)
    return jnp.transpose(out_rows.reshape(C, D), (1, 0))


def _reference(weights, x, num_dim, num_cls):
    D, C = num_dim, num_cls
    row_ind, col_ind = jnp.triu_indices(D, k=1)
    base = jnp.zeros((C, D, D), jnp.float32).at[:, row_ind, col_ind].set(weights)
    S = 0.5 * (base - jnp.transpose(base, (0, 2, 1)))
    I = jnp.eye(D, dtype=jnp.float32)
    cols = []
    for c in range(C):
        R = (I - S[c]) @ jnp.linalg.inv(I + S[c])
        cols.append(R @ x[:, c])
    return jnp.stack(cols, axis=1)


if __name__ == "__main__":
    num_dim = 128   # small but lane-aligned version of the default 256
    num_cls = 4
    ngf = (num_dim - 1) * num_dim // 2

    key = jax.random.PRNGKey(0)
    k_w, k_x = jax.random.split(key)
    # deterministic stand-in for the per-class Conv2d(ngf, 1, 1, bias=False) weights
    weights = 0.02 * jax.random.normal(k_w, (num_cls, ngf), dtype=jnp.float32)
    x = jax.random.normal(k_x, (num_dim, num_cls), dtype=jnp.float32)

    out = cayley_rot_forward(weights, x, num_dim, num_cls)
    out = jax.block_until_ready(out)

    ref = _reference(weights, x, num_dim, num_cls)
    assert out.shape == (num_dim, num_cls)
    assert jnp.allclose(out, ref, rtol=2e-3, atol=2e-3), "mismatch vs reference"
    print("KERNEL_OK")
</pallas_src>

<mosaic_0001>
module attributes {stable_mosaic.version = 11 : i64} {
  func.func @_cayley_kernel(%arg0: i32, %arg1: memref<4x1x128xf32, #tpu.memory_space<vmem>>, %arg2: memref<4x128x128xf32, #tpu.memory_space<vmem>>, %arg3: memref<4x1x128xf32, #tpu.memory_space<vmem>>) attributes {dimension_semantics = [#tpu.dimension_semantics<arbitrary>], iteration_bounds = array<i64: 1>, scalar_prefetch = 0 : i64, scratch_operands = 0 : i64, tpu.core_type = #tpu.core_type<tc>, window_params = [{pipeline_mode = #tpu.pipeline_mode<synchronous>, transform_indices = @transform_0, window_bounds = array<i64: 4, 1, 128>}, {pipeline_mode = #tpu.pipeline_mode<synchronous>, transform_indices = @transform_1, window_bounds = array<i64: 4, 128, 128>}, {pipeline_mode = #tpu.pipeline_mode<synchronous>, transform_indices = @transform_2, window_bounds = array<i64: 4, 1, 128>}]} {
    %c0 = arith.constant 0 : index
    %c0_0 = arith.constant 0 : index
    %c0_1 = arith.constant 0 : index
    %0 = vector.load %arg1[%c0, %c0_0, %c0_1] : memref<4x1x128xf32, #tpu.memory_space<vmem>>, vector<4x1x128xf32>
    %c0_2 = arith.constant 0 : index
    %c0_3 = arith.constant 0 : index
    %c0_4 = arith.constant 0 : index
    %1 = vector.load %arg2[%c0_2, %c0_3, %c0_4] : memref<4x128x128xf32, #tpu.memory_space<vmem>>, vector<4x128x128xf32>
    "tpu.trace_start"() <{level = 10 : i32, message = "cod,cde->coe"}> : () -> ()
    %cst = arith.constant dense<0.000000e+00> : vector<4x1x128xf32>
    %2 = tpu.matmul %0, %1, %cst {dimension_numbers = #tpu.dot_dimension_numbers<[2], [1], [1], [2], [0, 0, 0, 1, 1, 2], [0], [0]>} : vector<4x1x128xf32>, vector<4x128x128xf32>, vector<4x1x128xf32> -> vector<4x1x128xf32>
    "tpu.trace_stop"() : () -> ()
    %3 = arith.addf %0, %2 : vector<4x1x128xf32>
    %c0_5 = arith.constant 0 : index
    %c0_6 = arith.constant 0 : index
    %c0_7 = arith.constant 0 : index
    %4 = vector.load %arg3[%c0_5, %c0_6, %c0_7] : memref<4x1x128xf32, #tpu.memory_space<vmem>>, vector<4x1x128xf32>
    tpu.vector_store %arg3[%c0_5, %c0_6, %c0_7], %3 {strides = array<i32>} : memref<4x1x128xf32, #tpu.memory_space<vmem>>, vector<4x1x128xf32>,
    return
  }
  func.func @transform_0(%arg0: i32) -> (i32, i32, i32) {
    %c0_i32 = arith.constant 0 : i32
    %c0_i32_0 = arith.constant 0 : i32
    %c0_i32_1 = arith.constant 0 : i32
    %c0_i32_2 = arith.constant 0 : i32
    return %c0_i32, %c0_i32_0, %c0_i32_1 : i32, i32, i32
  }
  func.func @transform_1(%arg0: i32) -> (i32, i32, i32) {
    %c0_i32 = arith.constant 0 : i32
    %c0_i32_0 = arith.constant 0 : i32
    %c0_i32_1 = arith.constant 0 : i32
    %c0_i32_2 = arith.constant 0 : i32
    return %c0_i32, %c0_i32_0, %c0_i32_1 : i32, i32, i32
  }
  func.func @transform_2(%arg0: i32) -> (i32, i32, i32) {
    %c0_i32 = arith.constant 0 : i32
    %c0_i32_0 = arith.constant 0 : i32
    %c0_i32_1 = arith.constant 0 : i32
    %c0_i32_2 = arith.constant 0 : i32
    return %c0_i32, %c0_i32_0, %c0_i32_1 : i32, i32, i32
  }
}

</mosaic_0001>

<bundles_post_ra>
// kernel: tpu_custom_call.1
= control target key start
LH: loop header
LB: loop body
LE: loop exit
PB: predicated region body
PF: predicated region fallthrough
CT: control target
= control target key end

     0   :  { %7 = vsyncpa [#allocation3], 0  ;;  %s342_s0 = inlined_call_operand.hbm [shape: f32[4,1,128], index: 0, kind: input, shape index: {}]   ;;  %s343_s1 = inlined_call_operand.hbm [shape: f32[4,128,128], index: 1, kind: input, shape index: {}]   ;;  %s344_s2 = inlined_call_operand.hbm [shape: f32[4,1,128], index: 2, kind: output, shape index: {}]  }
   0x1   :  { %8 = vsyncpa [#allocation6], 0 }
   0x2   :  { %9 = vsyncpa [#allocation4], 0  ;;  %s14_s11 = sshll.u32 %s342_s0, 4  ;;  %s305_s12 = smov [#allocation2]   ;;  %s15_s11 = int_to_ptr.hbm [resolvable:$true] %s14_s11 }
   0x3   :  { %s16_s13 = sshll.u32 %s305_s12, 4  ;;  %s27_s16 = sshll.u32 %s343_s1, 4  ;;  %s17_s13 = int_to_ptr.vmem [resolvable:$true] %s16_s13  ;;  %s28_s16 = int_to_ptr.hbm [resolvable:$true] %s27_s16 }
   0x4   :  { %s306_s17 = smov 16   ;;  %s307_s18 = smov 1  }
   0x5   :  { %22 = dma.hbm_to_vmem [thread:$0]  %s15_s11, 64, %s17_s13, [#allocation3], %s306_s17, %s306_s17, %s307_s18  }
   0x6   :  { %s308_s19 = smov [#allocation5]   ;;  %s309_s21 = smov 128  }
   0x7   :  { %s29_s20 = sshll.u32 %s308_s19, 4  ;;  %s310_s0 = smov 8   ;;  %s30_s20 = int_to_ptr.vmem [resolvable:$true] %s29_s20 }
   0x8   :  { %35 = dma.hbm_to_vmem [thread:$0]  %s28_s16, 8192, %s30_s20, [#allocation6], %s309_s21, %s309_s21, %s310_s0  }
   0x9   :  { %299 = dma.done.wait [#allocation3], 64  }
   0xa   :  { %300 = vsyncadd [#allocation3], 4294967232 }
   0xb   :  { %301 = dma.done.wait [#allocation6], 8192  }
   0xc   :  { %302 = vsyncadd [#allocation6], 4294959104  ;;  %v95_v0 = vld [vmem:[#allocation5 + $0x178] sm:$0xff]  ;;  %v94_v2 = vld [vmem:[#allocation5 + $0x170] sm:$0xff]  ;;  %s311_s1 = smov [#allocation7]   ;;  %s206_s25 = sshll.u32 %s344_s2, 4  ;;  %s207_s25 = int_to_ptr.hbm [resolvable:$true] %s206_s25 }
   0xd   :  { %v111_v1 = vld [vmem:[#allocation5 + $0x1f8] sm:$0xff]  ;;  %152 = vmatpush.msra.mxu2 %v95_v0  ;;  %v110_v3 = vld [vmem:[#allocation5 + $0x1f0] sm:$0xff]  ;;  %v93_v4 = vld [vmem:[#allocation5 + $0x168] sm:$0xff]  ;;  %s204_s22 = sshll.u32 %s311_s1, 4  ;;  %s205_s22 = int_to_ptr.vmem [resolvable:$true] %s204_s22 }
   0xe   :  { %172 = vmatpush.msra.mxu3 %v111_v1  ;;  %v109_v5 = vld [vmem:[#allocation5 + $0x1e8] sm:$0xff]  ;;  %v63_v6 = vld [vmem:[#allocation5 + $0x78] sm:$0xff]  ;;  %v62_v8 = vld [vmem:[#allocation5 + $0x70] sm:$0xff] }
   0xf   :  { %v79_v7 = vld [vmem:[#allocation5 + $0xf8] sm:$0xff]  ;;  %153 = vmatpush.msra.mxu2 %v94_v2  ;;  %v78_v9 = vld [vmem:[#allocation5 + $0xf0] sm:$0xff]  ;;  %112 = vmatpush.msra.mxu0 %v63_v6  ;;  %v92_v10 = vld [vmem:[#allocation5 + $0x160] sm:$0xff] }
  0x10   :  { %173 = vmatpush.msra.mxu3 %v110_v3  ;;  %132 = vmatpush.msra.mxu1 %v79_v7  ;;  %v108_v11 = vld [vmem:[#allocation5 + $0x1e0] sm:$0xff]  ;;  %v61_v12 = vld [vmem:[#allocation5 + $0x68] sm:$0xff]  ;;  %v91_v14 = vld [vmem:[#allocation5 + $0x158] sm:$0xff] }
  0x11   :  { %154 = vmatpush.msra.mxu2 %v93_v4  ;;  %v77_v13 = vld [vmem:[#allocation5 + $0xe8] sm:$0xff]  ;;  %113 = vmatpush.msra.mxu0 %v62_v8  ;;  %v107_v15 = vld [vmem:[#allocation5 + $0x1d8] sm:$0xff]  ;;  %v60_v16 = vld [vmem:[#allocation5 + $0x60] sm:$0xff] }
  0x12   :  { %174 = vmatpush.msra.mxu3 %v109_v5  ;;  %133 = vmatpush.msra.mxu1 %v78_v9  ;;  %v76_v17 = vld [vmem:[#allocation5 + $0xe0] sm:$0xff]  ;;  %v90_v18 = vld [vmem:[#allocation5 + $0x150] sm:$0xff]  ;;  %v59_v20 = vld [vmem:[#allocation5 + $0x58] sm:$0xff] }
  0x13   :  { %155 = vmatpush.msra.mxu2 %v92_v10  ;;  %114 = vmatpush.msra.mxu0 %v61_v12  ;;  %v106_v19 = vld [vmem:[#allocation5 + $0x1d0] sm:$0xff]  ;;  %v75_v21 = vld [vmem:[#allocation5 + $0xd8] sm:$0xff]  ;;  %v89_v22 = vld [vmem:[#allocation5 + $0x148] sm:$0xff] }
  0x14   :  { %175 = vmatpush.msra.mxu3 %v108_v11  ;;  %134 = vmatpush.msra.mxu1 %v77_v13  ;;  %v105_v23 = vld [vmem:[#allocation5 + $0x1c8] sm:$0xff]  ;;  %v58_v24 = vld [vmem:[#allocation5 + $0x50] sm:$0xff]  ;;  %v88_v26 = vld [vmem:[#allocation5 + $0x140] sm:$0xff] }
  0x15   :  { %156 = vmatpush.msra.mxu2 %v91_v14  ;;  %115 = vmatpush.msra.mxu0 %v60_v16  ;;  %v74_v25 = vld [vmem:[#allocation5 + $0xd0] sm:$0xff]  ;;  %v104_v27 = vld [vmem:[#allocation5 + $0x1c0] sm:$0xff]  ;;  %v57_v28 = vld [vmem:[#allocation5 + $0x48] sm:$0xff] }
  0x16   :  { %176 = vmatpush.msra.mxu3 %v107_v15  ;;  %135 = vmatpush.msra.mxu1 %v76_v17  ;;  %v73_v29 = vld [vmem:[#allocation5 + $0xc8] sm:$0xff]  ;;  %v87_v30 = vld [vmem:[#allocation5 + $0x138] sm:$0xff]  ;;  %v56_v32 = vld [vmem:[#allocation5 + $0x40] sm:$0xff] }
  0x17   :  { %157 = vmatpush.msra.mxu2 %v90_v18  ;;  %116 = vmatpush.msra.mxu0 %v59_v20  ;;  %v103_v31 = vld [vmem:[#allocation5 + $0x1b8] sm:$0xff]  ;;  %v72_v33 = vld [vmem:[#allocation5 + $0xc0] sm:$0xff]  ;;  %v86_v34 = vld [vmem:[#allocation5 + $0x130] sm:$0xff] }
  0x18   :  { %177 = vmatpush.msra.mxu3 %v106_v19  ;;  %136 = vmatpush.msra.mxu1 %v75_v21  ;;  %v102_v35 = vld [vmem:[#allocation5 + $0x1b0] sm:$0xff]  ;;  %v55_v36 = vld [vmem:[#allocation5 + $0x38] sm:$0xff]  ;;  %v85_v38 = vld [vmem:[#allocation5 + $0x128] sm:$0xff] }
  0x19   :  { %158 = vmatpush.msra.mxu2 %v89_v22  ;;  %117 = vmatpush.msra.mxu0 %v58_v24  ;;  %v71_v37 = vld [vmem:[#allocation5 + $0xb8] sm:$0xff]  ;;  %v101_v39 = vld [vmem:[#allocation5 + $0x1a8] sm:$0xff]  ;;  %v54_v40 = vld [vmem:[#allocation5 + $0x30] sm:$0xff] }
  0x1a   :  { %178 = vmatpush.msra.mxu3 %v105_v23  ;;  %137 = vmatpush.msra.mxu1 %v74_v25  ;;  %v70_v41 = vld [vmem:[#allocation5 + $0xb0] sm:$0xff]  ;;  %v84_v42 = vld [vmem:[#allocation5 + $0x120] sm:$0xff]  ;;  %v53_v44 = vld [vmem:[#allocation5 + $0x28] sm:$0xff] }
  0x1b   :  { %159 = vmatpush.msra.mxu2 %v88_v26  ;;  %118 = vmatpush.msra.mxu0 %v57_v28  ;;  %v100_v43 = vld [vmem:[#allocation5 + $0x1a0] sm:$0xff]  ;;  %v69_v45 = vld [vmem:[#allocation5 + $0xa8] sm:$0xff]  ;;  %v83_v46 = vld [vmem:[#allocation5 + $0x118] sm:$0xff] }
  0x1c   :  { %179 = vmatpush.msra.mxu3 %v104_v27  ;;  %138 = vmatpush.msra.mxu1 %v73_v29  ;;  %v99_v47 = vld [vmem:[#allocation5 + $0x198] sm:$0xff]  ;;  %v52_v48 = vld [vmem:[#allocation5 + $0x20] sm:$0xff]  ;;  %v82_v50 = vld [vmem:[#allocation5 + $0x110] sm:$0xff] }
  0x1d   :  { %160 = vmatpush.msra.mxu2 %v87_v30  ;;  %119 = vmatpush.msra.mxu0 %v56_v32  ;;  %v68_v49 = vld [vmem:[#allocation5 + $0xa0] sm:$0xff]  ;;  %v98_v51 = vld [vmem:[#allocation5 + $0x190] sm:$0xff]  ;;  %v51_v52 = vld [vmem:[#allocation5 + $0x18] sm:$0xff] }
  0x1e   :  { %180 = vmatpush.msra.mxu3 %v103_v31  ;;  %139 = vmatpush.msra.mxu1 %v72_v33  ;;  %v67_v53 = vld [vmem:[#allocation5 + $0x98] sm:$0xff]  ;;  %v81_v54 = vld [vmem:[#allocation5 + $0x108] sm:$0xff]  ;;  %v50_v56 = vld [vmem:[#allocation5 + $0x10] sm:$0xff] }
  0x1f   :  { %161 = vmatpush.msra.mxu2 %v86_v34  ;;  %120 = vmatpush.msra.mxu0 %v55_v36  ;;  %v97_v55 = vld [vmem:[#allocation5 + $0x188] sm:$0xff]  ;;  %v66_v57 = vld [vmem:[#allocation5 + $0x90] sm:$0xff]  ;;  %v80_v58 = vld [vmem:[#allocation5 + $0x100] sm:$0xff] }
  0x20   :  { %181 = vmatpush.msra.mxu3 %v102_v35  ;;  %140 = vmatpush.msra.mxu1 %v71_v37  ;;  %v96_v59 = vld [vmem:[#allocation5 + $0x180] sm:$0xff]  ;;  %v46_v60 = vld [vmem:[#allocation2 + $0x2] sm:$0x1]  ;;  %v47_v61 = vld [vmem:[#allocation2 + $0x3] sm:$0x1] }
  0x21   :  { %162 = vmatpush.msra.mxu2 %v85_v38  ;;  %121 = vmatpush.msra.mxu0 %v54_v40  ;;  %v49_v62 = vld [vmem:[#allocation5 + $0x8] sm:$0xff]  ;;  %v48_v0 = vld [vmem:[#allocation5] sm:$0xff]  ;;  %v44_v2 = vld [vmem:[#allocation2] sm:$0x1] }
  0x22   :  { %182 = vmatpush.msra.mxu3 %v101_v39  ;;  %141 = vmatpush.msra.mxu1 %v70_v41  ;;  %v65_v63 = vld [vmem:[#allocation5 + $0x88] sm:$0xff]  ;;  %v64_v1 = vld [vmem:[#allocation5 + $0x80] sm:$0xff]  ;;  %v45_v3 = vld [vmem:[#allocation2 + $0x1] sm:$0x1] }
  0x23   :  { %163 = vmatpush.msra.mxu2 %v84_v42  ;;  %122 = vmatpush.msra.mxu0 %v53_v44 }
  0x24   :  { %183 = vmatpush.msra.mxu3 %v100_v43  ;;  %142 = vmatpush.msra.mxu1 %v69_v45 }
  0x25   :  { %164 = vmatpush.msra.mxu2 %v83_v46  ;;  %123 = vmatpush.msra.mxu0 %v52_v48 }
  0x26   :  { %184 = vmatpush.msra.mxu3 %v99_v47  ;;  %143 = vmatpush.msra.mxu1 %v68_v49 }
  0x27   :  { %165 = vmatpush.msra.mxu2 %v82_v50  ;;  %124 = vmatpush.msra.mxu0 %v51_v52 }
  0x28   :  { %185 = vmatpush.msra.mxu3 %v98_v51  ;;  %144 = vmatpush.msra.mxu1 %v67_v53 }
  0x29   :  { %166 = vmatpush.msra.mxu2 %v81_v54  ;;  %125 = vmatpush.msra.mxu0 %v50_v56 }
  0x2a   :  { %186 = vmatpush.msra.mxu3 %v97_v55  ;;  %145 = vmatpush.msra.mxu1 %v66_v57 }
  0x2b   :  { %167 = vmatpush.msra.mxu2 %v80_v58  ;;  %126 = vmatpush.msra.mxu0 %v49_v62 }
  0x2c   :  { %187 = vmatpush.msra.mxu3 %v96_v59  ;;  %168 = vmatmul.f32.vlgmr.msra.gmra.mxu2 %v46_v60 }
  0x2d   :  { %188 = vmatmul.f32.vlgmr.msra.gmra.mxu3 %v47_v61  ;;  %146 = vmatpush.msra.mxu1 %v65_v63 }
  0x2e   :  { %127 = vmatpush.msra.mxu0 %v48_v0 }
  0x2f   :  { %147 = vmatpush.msra.mxu1 %v64_v1  ;;  %128 = vmatmul.f32.vlgmr.msra.gmra.mxu0 %v44_v2 }
  0x30   :  { %148 = vmatmul.f32.vlgmr.msra.gmra.mxu1 %v45_v3 }
  0xac   :  { %v129_v4 = vpop.f32.mrf.mxu0 }
  0xad   :  { %v149_v5 = vpop.f32.mrf.mxu1  ;;  %v192_v6 = vadd.f32 %v129_v4, %v44_v2 }
  0xae   :  { %v193_v7 = vadd.f32 %v149_v5, %v45_v3 }
  0xaf   :  { %v169_v8 = vpop.f32.mrf.mxu2  ;;  %196 = vst [vmem:[#allocation7] sm:$0x1] %v192_v6 }
  0xb0   :  { %v189_v9 = vpop.f32.mrf.mxu3  ;;  %v194_v10 = vadd.f32 %v169_v8, %v46_v60  ;;  %197 = vst [vmem:[#allocation7 + $0x1] sm:$0x1] %v193_v7 }
  0xb1   :  { %v195_v11 = vadd.f32 %v189_v9, %v47_v61 }
  0xb2   :  { %198 = vst [vmem:[#allocation7 + $0x2] sm:$0x1] %v194_v10 }
  0xb3   :  { %199 = vst [vmem:[#allocation7 + $0x3] sm:$0x1] %v195_v11 }
  0xb4   :  { %212 = dma.vmem_to_hbm [thread:$0]  %s205_s22, 64, %s207_s25, [#allocation4], %s306_s17, %s306_s17, %s307_s18  }
  0xb5   :  { %303 = dma.done.wait [#allocation4], 64  }
  0xb6   :  { %304 = vsyncadd [#allocation4], 4294967232 }
  0xb7   :  { %217 = vsyncpa [#allocation3], 1 }
  0xb8   :  { %218 = vsyncpa [#allocation6], 1 }
  0xb9   :  { %219 = vsyncpa [#allocation4], 1 }

</bundles_post_ra>
